<compile_context>
chip_gen: v5e
topology: v5e:2x2
jax: 0.10.0
libtpu: 0.0.40
codegen_flags: <defaults>
</compile_context>

<pallas_src>
import functools

import jax
import jax.numpy as jnp
from jax.experimental import pallas as pl
from jax.experimental.pallas import tpu as pltpu

D_IN = 7           # [cam_id, r(3), t(3)]
D_IN_PAD = 8       # K padded to the f32 sublane width (extra entries are zero)
HIDDEN = 256
D_OUT = 6          # [dr(3), dt(3)]
D_OUT_PAD = 128    # lane-dense output (unmasked full-vreg stores)
OUT_COL0 = 1       # refined values live at output lanes [1, 7) (match input r,t lanes)
N_HIDDEN_LAYERS = 2
SCALE = 1e-6
MODE = "porf"
SUBLANE = 8


def _round_up(x, m):
    return (x + m - 1) // m * m


def _elu(x):
    # nn.ELU(alpha=1.0). Negative branch uses exp(min(x,0)) - 1 (known-good
    # Mosaic lowering); cancellation error is irrelevant under the 1e-6 scale.
    # TODO(synk): switch to jnp.expm1 once its Mosaic lowering is confirmed.
    return jnp.where(x > 0, x, jnp.exp(jnp.minimum(x, 0.0)) - 1.0)


# ---------------------------------------------------------------------------
# Pallas kernel: batched MLP (4 matmuls + 3 ELUs), in-kernel feature build,
# fused scale + residual, single lane-dense output store.
# ---------------------------------------------------------------------------
def porf_mlp_kernel(rt_ref, w0_ref, b0_ref, w1_ref, b1_ref,
                    w2_ref, b2_ref, w3_ref, b3_ref, o_ref,
                    *, num_cams, mode):
    m = rt_ref.shape[0]
    rt = rt_ref[...]                                           # (m, 8): [0, r, t, 0]

    # ---- build MLP input in-kernel (iota + selects: free VPU filler) ----
    row = jax.lax.broadcasted_iota(jnp.int32, (m, D_IN_PAD), 0).astype(jnp.float32)
    lane = jax.lax.broadcasted_iota(jnp.int32, (m, D_IN_PAD), 1)
    cam_feat = row / num_cams * 2.0 - 1.0
    cam_col = jnp.where(lane == 0, cam_feat, 0.0)
    if mode == "porf":
        x = rt + cam_col                                        # rt lane 0 is zero
    elif mode == "index_only":
        x = cam_col
    elif mode == "pose_only":
        x = rt
    else:
        raise ValueError(mode)

    # Layer 0 (tiny, f32 weights).
    h = jnp.dot(x, w0_ref[...], preferred_element_type=jnp.float32) + b0_ref[...]
    h = _elu(h)
    # Hidden + output layers: bf16 weights/activations on the MXU, f32 accumulate.
    h = jnp.dot(h.astype(jnp.bfloat16), w1_ref[...],
                preferred_element_type=jnp.float32) + b1_ref[...]
    h = _elu(h)
    h = jnp.dot(h.astype(jnp.bfloat16), w2_ref[...],
                preferred_element_type=jnp.float32) + b2_ref[...]
    h = _elu(h)
    out = jnp.dot(h.astype(jnp.bfloat16), w3_ref[...],
                  preferred_element_type=jnp.float32) + b3_ref[...]   # (m, 128)

    # Fused: out * scale + [init_r, init_t] residual.  Scatter the compact
    # 8-lane rt into the 128-lane layout via a constant selection matmul so the
    # final store stays a single unmasked full-width vst.
    sel = (jax.lax.broadcasted_iota(jnp.int32, (D_IN_PAD, D_OUT_PAD), 0)
           == jax.lax.broadcasted_iota(jnp.int32, (D_IN_PAD, D_OUT_PAD), 1)
           ).astype(jnp.float32)                                # (8, 128) "identity"
    res = jnp.dot(rt, sel, preferred_element_type=jnp.float32)  # (m, 128), r,t at lanes 1..6
    o_ref[...] = out * SCALE + res


# ---------------------------------------------------------------------------
# Batched refinement wrapper (call ONCE per step and cache the result).
# ---------------------------------------------------------------------------
def _refine_all_impl(init_r, init_t, params, *, num_cams, mode=MODE):
    m_pad = max(SUBLANE, _round_up(num_cams, SUBLANE))
    # Single compact kernel input: (m_pad, 8) = [0, r(3), t(3), 0] per row.
    rt6 = jnp.concatenate([init_r, init_t], axis=-1).astype(jnp.float32)     # (N, 6)
    rt = jnp.pad(rt6, ((0, m_pad - num_cams), (1, D_IN_PAD - 1 - D_OUT)))    # (m_pad, 8)

    kernel = functools.partial(porf_mlp_kernel, num_cams=num_cams, mode=mode)
    args = (rt,) + tuple(params)
    in_specs = [pl.BlockSpec(memory_space=pltpu.MemorySpace.VMEM) for _ in args]

    flops = 2 * m_pad * (D_IN_PAD * HIDDEN
                         + N_HIDDEN_LAYERS * HIDDEN * HIDDEN
                         + HIDDEN * D_OUT_PAD
                         + D_IN_PAD * D_OUT_PAD)
    bytes_accessed = (sum(int(a.size) * a.dtype.itemsize for a in args)
                      + m_pad * D_OUT_PAD * 4)

    out_pad = pl.pallas_call(
        kernel,
        out_shape=jax.ShapeDtypeStruct((m_pad, D_OUT_PAD), jnp.float32),
        in_specs=in_specs,
        out_specs=pl.BlockSpec(memory_space=pltpu.MemorySpace.VMEM),
        cost_estimate=pl.CostEstimate(flops=flops,
                                      transcendentals=3 * m_pad * HIDDEN,
                                      bytes_accessed=bytes_accessed),
    )(*args)
    # TODO(synk): once num_cams grows large (~2K+ rows), add a row-block grid
    # axis with dimension_semantics=("parallel",) (weight index_maps -> (0, 0))
    # so both v7x TensorCores are used; gridless is latency-optimal at this size.

    refined = out_pad[:num_cams, OUT_COL0:OUT_COL0 + D_OUT]     # (N, 6)
    return refined[:, :3], refined[:, 3:]


porf_refine_all = jax.jit(_refine_all_impl, static_argnames=("num_cams", "mode"))


# ---------------------------------------------------------------------------
# Glue: axis-angle -> rotation matrix (Rodrigues), make_c2w (plain JAX)
# ---------------------------------------------------------------------------
def axis_angle_to_rotation_matrix(r, eps=1e-6):
    """r: (3,) axis-angle -> (3,3) rotation matrix (Rodrigues, small-angle safe)."""
    rx, ry, rz = r[0], r[1], r[2]
    theta2 = rx * rx + ry * ry + rz * rz
    theta = jnp.sqrt(theta2)
    inv = 1.0 / (theta + eps)
    wx, wy, wz = rx * inv, ry * inv, rz * inv
    c = jnp.cos(theta)
    s = jnp.sin(theta)
    one_c = 1.0 - c
    R_full = jnp.stack([
        jnp.stack([c + wx * wx * one_c, wx * wy * one_c - wz * s, wy * s + wx * wz * one_c]),
        jnp.stack([wz * s + wx * wy * one_c, c + wy * wy * one_c, -wx * s + wy * wz * one_c]),
        jnp.stack([-wy * s + wx * wz * one_c, wx * s + wy * wz * one_c, c + wz * wz * one_c]),
    ])
    one = jnp.ones_like(rx)
    R_taylor = jnp.stack([
        jnp.stack([one, -rz, ry]),
        jnp.stack([rz, one, -rx]),
        jnp.stack([-ry, rx, one]),
    ])
    return jnp.where(theta2 > eps, R_full, R_taylor)


def make_c2w(r, t):
    """r: (3,) axis-angle, t: (3,) translation -> (4,4) camera-to-world."""
    R = axis_angle_to_rotation_matrix(r)
    top = jnp.concatenate([R, t.reshape(3, 1)], axis=1)             # (3,4)
    bottom = jnp.array([[0.0, 0.0, 0.0, 1.0]], dtype=jnp.float32)   # (1,4)
    return jnp.concatenate([top, bottom], axis=0)


@jax.jit
def porf_pose(cam_id, r_all, t_all):
    """Per-camera forward given the cached batched refinement (cheap gather)."""
    return make_c2w(r_all[cam_id], t_all[cam_id])


@functools.partial(jax.jit, static_argnames=("num_cams", "mode"))
def porf_forward(cam_id, init_r, init_t, params, *, num_cams, mode=MODE):
    """One-off full forward matching PoRF.forward(cam_id) (prefer the cached path)."""
    r_all, t_all = _refine_all_impl(init_r, init_t, params, num_cams=num_cams, mode=mode)
    return make_c2w(r_all[cam_id], t_all[cam_id])


# ---------------------------------------------------------------------------
# Parameter init (deterministic, mimics nn.Linear's U(-1/sqrt(fan_in), ..)),
# stored pre-padded to the kernel layout; hidden/output weights in bf16.
# ---------------------------------------------------------------------------
def init_params(key):
    specs = [
        # (fan_in, fan_out, pad_in, pad_out, out_col0, weight_dtype)
        (D_IN, HIDDEN, D_IN_PAD, HIDDEN, 0, jnp.float32),
        (HIDDEN, HIDDEN, HIDDEN, HIDDEN, 0, jnp.bfloat16),
        (HIDDEN, HIDDEN, HIDDEN, HIDDEN, 0, jnp.bfloat16),
        (HIDDEN, D_OUT, HIDDEN, D_OUT_PAD, OUT_COL0, jnp.bfloat16),
    ]
    params = []
    for fan_in, fan_out, pi, po, c0, wdt in specs:
        key, kw, kb = jax.random.split(key, 3)
        bound = 1.0 / float(fan_in) ** 0.5
        w = jax.random.uniform(kw, (fan_in, fan_out), jnp.float32, -bound, bound)
        b = jax.random.uniform(kb, (fan_out,), jnp.float32, -bound, bound)
        w_pad = jnp.zeros((pi, po), jnp.float32).at[:fan_in, c0:c0 + fan_out].set(w)
        b_pad = jnp.zeros((1, po), jnp.float32).at[0, c0:c0 + fan_out].set(b)
        params += [w_pad.astype(wdt), b_pad]
    return tuple(params)


# ---------------------------------------------------------------------------
# Pure-JAX reference (f32 math, same padded params) for a loose sanity check.
# ---------------------------------------------------------------------------
def _refine_all_reference(init_r, init_t, params, *, num_cams, mode=MODE):
    w0, b0, w1, b1, w2, b2, w3, b3 = [p.astype(jnp.float32) for p in params]
    cam = (jnp.arange(num_cams, dtype=jnp.float32) / num_cams * 2.0 - 1.0)[:, None]
    zeros3 = jnp.zeros_like(init_r)
    if mode == "porf":
        feats = jnp.concatenate([cam, init_r, init_t], axis=-1)
    elif mode == "index_only":
        feats = jnp.concatenate([cam, zeros3, zeros3], axis=-1)
    else:
        feats = jnp.concatenate([jnp.zeros_like(cam), init_r, init_t], axis=-1)
    x = jnp.pad(feats, ((0, 0), (0, D_IN_PAD - D_IN)))

    def elu(v):
        return jnp.where(v > 0, v, jnp.exp(jnp.minimum(v, 0.0)) - 1.0)

    h = elu(x @ w0 + b0)
    h = elu(h @ w1 + b1)
    h = elu(h @ w2 + b2)
    out = (h @ w3 + b3)[:, OUT_COL0:OUT_COL0 + D_OUT] * SCALE
    return init_r + out[:, :3], init_t + out[:, 3:]


if __name__ == "__main__":
    key = jax.random.PRNGKey(0)
    k_params, k_r, k_t = jax.random.split(key, 3)

    num_cams = 8
    params = init_params(k_params)
    # Synthetic deterministic "initial poses" (axis-angle + translation per cam).
    init_r = 0.1 * jax.random.normal(k_r, (num_cams, 3), jnp.float32)
    init_t = jax.random.normal(k_t, (num_cams, 3), jnp.float32)

    # Batched refinement: run ONCE per step and cache (amortizes weight DMA + launch).
    r_all, t_all = porf_refine_all(init_r, init_t, params, num_cams=num_cams, mode=MODE)
    r_all, t_all = jax.block_until_ready((r_all, t_all))

    # Per-camera forward (semantics of PoRF.forward(cam_id)): cheap gather + make_c2w.
    c2w3 = jax.block_until_ready(porf_pose(jnp.int32(3), r_all, t_all))
    c2w0 = jax.block_until_ready(porf_pose(jnp.int32(0), r_all, t_all))

    assert c2w3.shape == (4, 4) and c2w3.dtype == jnp.float32
    assert bool(jnp.all(jnp.isfinite(c2w3))) and bool(jnp.all(jnp.isfinite(c2w0)))

    # Loose correctness check vs f32 reference (bf16 MXU deltas are * 1e-6 scaled).
    r_ref, t_ref = _refine_all_reference(init_r, init_t, params,
                                         num_cams=num_cams, mode=MODE)
    assert bool(jnp.all(jnp.abs(r_all - r_ref) < 1e-4))
    assert bool(jnp.all(jnp.abs(t_all - t_ref) < 1e-4))

    print("KERNEL_OK")
</pallas_src>

<mosaic_0001>
module attributes {stable_mosaic.version = 11 : i64} {
  func.func @porf_mlp_kernel(%arg0: memref<8x8xf32, #tpu.memory_space<vmem>>, %arg1: memref<8x256xf32, #tpu.memory_space<vmem>>, %arg2: memref<1x256xf32, #tpu.memory_space<vmem>>, %arg3: memref<256x256xbf16, #tpu.memory_space<vmem>>, %arg4: memref<1x256xf32, #tpu.memory_space<vmem>>, %arg5: memref<256x256xbf16, #tpu.memory_space<vmem>>, %arg6: memref<1x256xf32, #tpu.memory_space<vmem>>, %arg7: memref<256x128xbf16, #tpu.memory_space<vmem>>, %arg8: memref<1x128xf32, #tpu.memory_space<vmem>>, %arg9: memref<8x128xf32, #tpu.memory_space<vmem>>) attributes {dimension_semantics = [], scalar_prefetch = 0 : i64, scratch_operands = 0 : i64, tpu.core_type = #tpu.core_type<tc>} {
    %c0 = arith.constant 0 : index
    %c0_0 = arith.constant 0 : index
    %0 = vector.load %arg0[%c0, %c0_0] : memref<8x8xf32, #tpu.memory_space<vmem>>, vector<8x8xf32>
    %1 = tpu.iota {dimensions = array<i32: 0>} : vector<8x8xi32>
    %2 = arith.sitofp %1 : vector<8x8xi32> to vector<8x8xf32>
    %3 = tpu.iota {dimensions = array<i32: 1>} : vector<8x8xi32>
    %cst = arith.constant 8.000000e+00 : f32
    %4 = vector.broadcast %cst : f32 to vector<8x8xf32>
    %5 = arith.divf %2, %4 : vector<8x8xf32>
    %cst_1 = arith.constant 2.000000e+00 : f32
    %6 = vector.broadcast %cst_1 : f32 to vector<8x8xf32>
    %7 = arith.mulf %5, %6 : vector<8x8xf32>
    %cst_2 = arith.constant 1.000000e+00 : f32
    %8 = vector.broadcast %cst_2 : f32 to vector<8x8xf32>
    %9 = arith.subf %7, %8 : vector<8x8xf32>
    %c0_i32 = arith.constant 0 : i32
    %10 = vector.broadcast %c0_i32 : i32 to vector<8x8xi32>
    %11 = arith.cmpi eq, %3, %10 : vector<8x8xi32>
    %cst_3 = arith.constant 0.000000e+00 : f32
    %12 = vector.broadcast %cst_3 : f32 to vector<8x8xf32>
    %13 = arith.select %11, %9, %12 : vector<8x8xi1>, vector<8x8xf32>
    %14 = arith.addf %0, %13 : vector<8x8xf32>
    %c0_4 = arith.constant 0 : index
    %c0_5 = arith.constant 0 : index
    %15 = vector.load %arg1[%c0_4, %c0_5] : memref<8x256xf32, #tpu.memory_space<vmem>>, vector<8x256xf32>
    %cst_6 = arith.constant dense<0.000000e+00> : vector<8x256xf32>
    %16 = tpu.matmul %14, %15, %cst_6 {dimension_numbers = #tpu.dot_dimension_numbers<[1], [0], [0], [1], [0, 0, 1, 1], [], []>} : vector<8x8xf32>, vector<8x256xf32>, vector<8x256xf32> -> vector<8x256xf32>
    %c0_7 = arith.constant 0 : index
    %c0_8 = arith.constant 0 : index
    %17 = vector.load %arg2[%c0_7, %c0_8] : memref<1x256xf32, #tpu.memory_space<vmem>>, vector<1x256xf32>
    %18 = vector.broadcast %17 : vector<1x256xf32> to vector<8x256xf32>
    %19 = arith.addf %16, %18 : vector<8x256xf32>
    %cst_9 = arith.constant 0.000000e+00 : f32
    %20 = vector.broadcast %cst_9 : f32 to vector<8x256xf32>
    %21 = arith.cmpf ogt, %19, %20 : vector<8x256xf32>
    %cst_10 = arith.constant 0.000000e+00 : f32
    %22 = vector.broadcast %cst_10 : f32 to vector<8x256xf32>
    %23 = arith.minimumf %19, %22 : vector<8x256xf32>
    %24 = math.exp %23 : vector<8x256xf32>
    %cst_11 = arith.constant 1.000000e+00 : f32
    %25 = vector.broadcast %cst_11 : f32 to vector<8x256xf32>
    %26 = arith.subf %24, %25 : vector<8x256xf32>
    %27 = arith.select %21, %19, %26 : vector<8x256xi1>, vector<8x256xf32>
    %28 = arith.truncf %27 : vector<8x256xf32> to vector<8x256xbf16>
    %c0_12 = arith.constant 0 : index
    %c0_13 = arith.constant 0 : index
    %29 = vector.load %arg3[%c0_12, %c0_13] : memref<256x256xbf16, #tpu.memory_space<vmem>>, vector<256x256xbf16>
    %cst_14 = arith.constant dense<0.000000e+00> : vector<8x256xf32>
    %30 = tpu.matmul %28, %29, %cst_14 {dimension_numbers = #tpu.dot_dimension_numbers<[1], [0], [0], [1], [0, 0, 1, 1], [], []>} : vector<8x256xbf16>, vector<256x256xbf16>, vector<8x256xf32> -> vector<8x256xf32>
    %c0_15 = arith.constant 0 : index
    %c0_16 = arith.constant 0 : index
    %31 = vector.load %arg4[%c0_15, %c0_16] : memref<1x256xf32, #tpu.memory_space<vmem>>, vector<1x256xf32>
    %32 = vector.broadcast %31 : vector<1x256xf32> to vector<8x256xf32>
    %33 = arith.addf %30, %32 : vector<8x256xf32>
    %cst_17 = arith.constant 0.000000e+00 : f32
    %34 = vector.broadcast %cst_17 : f32 to vector<8x256xf32>
    %35 = arith.cmpf ogt, %33, %34 : vector<8x256xf32>
    %cst_18 = arith.constant 0.000000e+00 : f32
    %36 = vector.broadcast %cst_18 : f32 to vector<8x256xf32>
    %37 = arith.minimumf %33, %36 : vector<8x256xf32>
    %38 = math.exp %37 : vector<8x256xf32>
    %cst_19 = arith.constant 1.000000e+00 : f32
    %39 = vector.broadcast %cst_19 : f32 to vector<8x256xf32>
    %40 = arith.subf %38, %39 : vector<8x256xf32>
    %41 = arith.select %35, %33, %40 : vector<8x256xi1>, vector<8x256xf32>
    %42 = arith.truncf %41 : vector<8x256xf32> to vector<8x256xbf16>
    %c0_20 = arith.constant 0 : index
    %c0_21 = arith.constant 0 : index
    %43 = vector.load %arg5[%c0_20, %c0_21] : memref<256x256xbf16, #tpu.memory_space<vmem>>, vector<256x256xbf16>
    %cst_22 = arith.constant dense<0.000000e+00> : vector<8x256xf32>
    %44 = tpu.matmul %42, %43, %cst_22 {dimension_numbers = #tpu.dot_dimension_numbers<[1], [0], [0], [1], [0, 0, 1, 1], [], []>} : vector<8x256xbf16>, vector<256x256xbf16>, vector<8x256xf32> -> vector<8x256xf32>
    %c0_23 = arith.constant 0 : index
    %c0_24 = arith.constant 0 : index
    %45 = vector.load %arg6[%c0_23, %c0_24] : memref<1x256xf32, #tpu.memory_space<vmem>>, vector<1x256xf32>
    %46 = vector.broadcast %45 : vector<1x256xf32> to vector<8x256xf32>
    %47 = arith.addf %44, %46 : vector<8x256xf32>
    %cst_25 = arith.constant 0.000000e+00 : f32
    %48 = vector.broadcast %cst_25 : f32 to vector<8x256xf32>
    %49 = arith.cmpf ogt, %47, %48 : vector<8x256xf32>
    %cst_26 = arith.constant 0.000000e+00 : f32
    %50 = vector.broadcast %cst_26 : f32 to vector<8x256xf32>
    %51 = arith.minimumf %47, %50 : vector<8x256xf32>
    %52 = math.exp %51 : vector<8x256xf32>
    %cst_27 = arith.constant 1.000000e+00 : f32
    %53 = vector.broadcast %cst_27 : f32 to vector<8x256xf32>
    %54 = arith.subf %52, %53 : vector<8x256xf32>
    %55 = arith.select %49, %47, %54 : vector<8x256xi1>, vector<8x256xf32>
    %56 = arith.truncf %55 : vector<8x256xf32> to vector<8x256xbf16>
    %c0_28 = arith.constant 0 : index
    %c0_29 = arith.constant 0 : index
    %57 = vector.load %arg7[%c0_28, %c0_29] : memref<256x128xbf16, #tpu.memory_space<vmem>>, vector<256x128xbf16>
    %cst_30 = arith.constant dense<0.000000e+00> : vector<8x128xf32>
    %58 = tpu.matmul %56, %57, %cst_30 {dimension_numbers = #tpu.dot_dimension_numbers<[1], [0], [0], [1], [0, 0, 1, 1], [], []>} : vector<8x256xbf16>, vector<256x128xbf16>, vector<8x128xf32> -> vector<8x128xf32>
    %c0_31 = arith.constant 0 : index
    %c0_32 = arith.constant 0 : index
    %59 = vector.load %arg8[%c0_31, %c0_32] : memref<1x128xf32, #tpu.memory_space<vmem>>, vector<1x128xf32>
    %60 = vector.broadcast %59 : vector<1x128xf32> to vector<8x128xf32>
    %61 = arith.addf %58, %60 : vector<8x128xf32>
    %62 = tpu.iota {dimensions = array<i32: 0>} : vector<8x128xi32>
    %63 = tpu.iota {dimensions = array<i32: 1>} : vector<8x128xi32>
    %64 = arith.cmpi eq, %62, %63 : vector<8x128xi32>
    %65 = arith.extui %64 : vector<8x128xi1> to vector<8x128xi32>
    %66 = arith.sitofp %65 : vector<8x128xi32> to vector<8x128xf32>
    %cst_33 = arith.constant dense<0.000000e+00> : vector<8x128xf32>
    %67 = tpu.matmul %0, %66, %cst_33 {dimension_numbers = #tpu.dot_dimension_numbers<[1], [0], [0], [1], [0, 0, 1, 1], [], []>} : vector<8x8xf32>, vector<8x128xf32>, vector<8x128xf32> -> vector<8x128xf32>
    %cst_34 = arith.constant 9.99999997E-7 : f32
    %68 = vector.broadcast %cst_34 : f32 to vector<8x128xf32>
    %69 = arith.mulf %61, %68 : vector<8x128xf32>
    %70 = arith.addf %69, %67 : vector<8x128xf32>
    %c0_35 = arith.constant 0 : index
    %c0_36 = arith.constant 0 : index
    %71 = vector.load %arg9[%c0_35, %c0_36] : memref<8x128xf32, #tpu.memory_space<vmem>>, vector<8x128xf32>
    tpu.vector_store %arg9[%c0_35, %c0_36], %70 {strides = array<i32>} : memref<8x128xf32, #tpu.memory_space<vmem>>, vector<8x128xf32>,
    return
  }
}

</mosaic_0001>

<bundles_post_ra>
// kernel: _refine_all_impl.1
= control target key start
LH: loop header
LB: loop body
LE: loop exit
PB: predicated region body
PF: predicated region fallthrough
CT: control target
= control target key end

     0   :  { %14 = vsyncpa [#allocation3], 0  ;;  %s1505_s0 = inlined_call_operand.vmem [shape: f32[8,8], index: 0, kind: input, shape index: {}]   ;;  %s1506_s1 = inlined_call_operand.vmem [shape: f32[8,256], index: 1, kind: input, shape index: {}]   ;;  %s1507_s2 = inlined_call_operand.vmem [shape: f32[1,256], index: 2, kind: input, shape index: {}]   ;;  %s1508_s3 = inlined_call_operand.hbm [shape: bf16[256,256], index: 3, kind: input, shape index: {}]   ;;  %s1509_s4 = inlined_call_operand.vmem [shape: f32[1,256], index: 4, kind: input, shape index: {}]   ;;  %s1510_s5 = inlined_call_operand.hbm [shape: bf16[256,256], index: 5, kind: input, shape index: {}]   ;;  %s1511_s6 = inlined_call_operand.vmem [shape: f32[1,256], index: 6, kind: input, shape index: {}]   ;;  %s1512_s7 = inlined_call_operand.hbm [shape: bf16[256,128], index: 7, kind: input, shape index: {}]   ;;  %s1513_s8 = inlined_call_operand.vmem [shape: f32[1,128], index: 8, kind: input, shape index: {}]   ;;  %s1514_s9 = inlined_call_operand.vmem [shape: f32[8,128], index: 9, kind: output, shape index: {}]  }
   0x1   :  { %15 = vsyncpa [#allocation5], 0  ;;  %s41_s11 = sshll.u32 %s1510_s5, 4  ;;  %s1397_s12 = smov [#allocation4]   ;;  %s42_s11 = int_to_ptr.hbm [resolvable:$true] %s41_s11 }
   0x2   :  { %s43_s13 = sshll.u32 %s1397_s12, 4  ;;  %s26_s16 = sshll.u32 %s1508_s3, 4  ;;  %s44_s13 = int_to_ptr.vmem [resolvable:$true] %s43_s13  ;;  %s27_s16 = int_to_ptr.hbm [resolvable:$true] %s26_s16 }
   0x3   :  { %s1398_s17 = smov 128   ;;  %s1399_s18 = smov 8  }
   0x4   :  { %49 = dma.hbm_to_vmem [thread:$0]  %s42_s11, 4096, %s44_s13, [#allocation5], %s1398_s17, %s1398_s17, %s1399_s18  }
   0x5   :  { %s1400_s19 = smov [#allocation2]   ;;  %s56_s23 = sshll.u32 %s1512_s7, 4  ;;  %s57_s23 = int_to_ptr.hbm [resolvable:$true] %s56_s23 }
   0x6   :  { %s28_s20 = sshll.u32 %s1400_s19, 4  ;;  %s1401_s5 = smov [#allocation6]   ;;  %s29_s20 = int_to_ptr.vmem [resolvable:$true] %s28_s20 }
   0x7   :  { %34 = dma.hbm_to_vmem [thread:$0]  %s27_s16, 4096, %s29_s20, [#allocation3], %s1398_s17, %s1398_s17, %s1399_s18  }
   0x8   :  { %s58_s24 = sshll.u32 %s1401_s5, 4  ;;  %s1402_s25 = smov 64   ;;  %s59_s24 = int_to_ptr.vmem [resolvable:$true] %s58_s24 }
   0x9   :  { %s1403_s26 = smov 4  }
   0xa   :  { %64 = dma.hbm_to_vmem [thread:$0]  %s57_s23, 2048, %s59_s24, [#allocation5], %s1402_s25, %s1402_s25, %s1403_s26  }
   0xb   :  { %1393 = dma.done.wait [#allocation3], 4096  }
   0xc   :  { %1394 = vsyncadd [#allocation3], 4294963200 }
   0xd   :  { %1395 = dma.done.wait [#allocation5], 6144  }
   0xe   :  { %1396 = vsyncadd [#allocation5], 4294961152  ;;  %v1404_v0 = vmov 8.0   ;;  %v80_v1 = vlaneseq  ;;  %v98_v3 = vld [vmem:[%s1506_s1] sm:$0xff]  ;;  %v99_v4 = vld [vmem:[%s1506_s1 + $0x8] sm:$0xff]  ;;  %vm106_vm2 = vcmask 64512  }
   0xf   :  { %1307 = vrcp.f32 %v1404_v0  ;;  %125 = vmatpush.msra.mxu0 %v98_v3  ;;  %145 = vmatpush.msra.mxu1 %v99_v4  ;;  %v948_v7 = vld [vmem:[#allocation2 + $0x70] sm:$0xf]  ;;  %v1232_v8 = vld [vmem:[#allocation2 + $0x74] sm:$0xf0]  ;;  %v1231_v12 = vld [vmem:[#allocation2 + $0x74] sm:$0xf] }
  0x10   :  { %v1471_v5 = vshrl.u32 %v80_v1, 7  ;;  %v949_v9 = vor.u32 %v1232_v8, %v948_v7  ;;  %v1012_v10 = vld [vmem:[#allocation2 + $0xf0] sm:$0xf]  ;;  %v1248_v11 = vld [vmem:[#allocation2 + $0xf4] sm:$0xf0]  ;;  %v1474_v42 = vand.u32 127, %v80_v1 }
  0x11   :  { %v1013_v14 = vor.u32 %v1248_v11, %v1012_v10  ;;  %v950_v15 = vld [vmem:[#allocation2 + $0x78] sm:$0xf0]  ;;  %v1247_v16 = vld [vmem:[#allocation2 + $0xf4] sm:$0xf]  ;;  %v940_v19 = vld [vmem:[#allocation2 + $0x60] sm:$0xf] }
  0x12   :  { %362 = vmatpush.bf16.msra.mxu2 %v949_v9  ;;  %v953_v17 = vor.u32 %v1231_v12, %v950_v15  ;;  %v1014_v18 = vld [vmem:[#allocation2 + $0xf8] sm:$0xf0]  ;;  %v1230_v20 = vld [vmem:[#allocation2 + $0x64] sm:$0xf0]  ;;  %v1004_v24 = vld [vmem:[#allocation2 + $0xe0] sm:$0xf]  ;;  %v82_v27 = vcvt.s32.f32 %v1471_v5  ;;  %vm850_vm7 = vcmp.eq.s32.totalorder %v1471_v5, %v1474_v42 }
  0x13   :  { %375 = vmatpush.bf16.msra.mxu3 %v1013_v14  ;;  %v1017_v22 = vor.u32 %v1247_v16, %v1014_v18  ;;  %v941_v23 = vor.u32 %v1230_v20, %v940_v19  ;;  %v1246_v25 = vld [vmem:[#allocation2 + $0xe4] sm:$0xf0]  ;;  %v1229_v26 = vld [vmem:[#allocation2 + $0x64] sm:$0xf]  ;;  %v942_v29 = vld [vmem:[#allocation2 + $0x68] sm:$0xf0] }
  0x14   :  { %388 = vmatpush.bf16.msrb.mxu0 %v953_v17  ;;  %v1005_v28 = vor.u32 %v1246_v25, %v1004_v24  ;;  %v1245_v30 = vld [vmem:[#allocation2 + $0xe4] sm:$0xf]  ;;  %v1006_v31 = vld [vmem:[#allocation2 + $0xe8] sm:$0xf0]  ;;  %v945_v33 = vor.u32 %v1229_v26, %v942_v29  ;;  %v932_v35 = vld [vmem:[#allocation2 + $0x50] sm:$0xf] }
  0x15   :  { %v1308_v2 = vpop.eup %1307  ;;  %401 = vmatpush.bf16.msrb.mxu1 %v1017_v22  ;;  %v1009_v34 = vor.u32 %v1245_v30, %v1006_v31  ;;  %v1228_v36 = vld [vmem:[#allocation2 + $0x54] sm:$0xf0]  ;;  %v996_v37 = vld [vmem:[#allocation2 + $0xd0] sm:$0xf]  ;;  %v1227_v40 = vld [vmem:[#allocation2 + $0x54] sm:$0xf] }
  0x16   :  { %v86_v6 = vmul.f32 8.0, %v1308_v2  ;;  %vm90_vm0 = vweird.f32 %v1308_v2  ;;  %363 = vmatpush.bf16.msra.mxu2 %v941_v23  ;;  %v933_v38 = vor.u32 %v1228_v36, %v932_v35  ;;  %v1244_v39 = vld [vmem:[#allocation2 + $0xd4] sm:$0xf0]  ;;  %v934_v41 = vld [vmem:[#allocation2 + $0x58] sm:$0xf0]  ;;  %vm95_vm1 = vcmp.eq.s32.totalorder %v1474_v42, 0 }
  0x17   :  { %376 = vmatpush.bf16.msra.mxu3 %v1005_v28  ;;  %v997_v44 = vor.u32 %v1244_v39, %v996_v37  ;;  %v1243_v45 = vld [vmem:[#allocation2 + $0xd4] sm:$0xf]  ;;  %v998_v46 = vld [vmem:[#allocation2 + $0xd8] sm:$0xf0]  ;;  %v937_v48 = vor.u32 %v1227_v40, %v934_v41  ;;  %v1481_v51 = vld [vmem:[%s1505_s0] sm:$0xff] }
  0x18   :  { %v87_v13 = vsub.f32 1.0, %v86_v6  ;;  %389 = vmatpush.bf16.msrb.mxu0 %v945_v33  ;;  %v1001_v49 = vor.u32 %v1243_v45, %v998_v46  ;;  %v924_v55 = vld [vmem:[#allocation2 + $0x40] sm:$0xf]  ;;  %v1226_v56 = vld [vmem:[#allocation2 + $0x44] sm:$0xf0] }
  0x19   :  { %402 = vmatpush.bf16.msrb.mxu1 %v1009_v34  ;;  %v988_v57 = vld [vmem:[#allocation2 + $0xc0] sm:$0xf]  ;;  %v925_v58 = vor.u32 %v1226_v56, %v924_v55  ;;  %v1242_v59 = vld [vmem:[#allocation2 + $0xc4] sm:$0xf0]  ;;  %v1225_v60 = vld [vmem:[#allocation2 + $0x44] sm:$0xf] }
  0x1a   :  { %v88_v21 = vmul.f32 %v1308_v2, %v87_v13  ;;  %364 = vmatpush.bf16.msra.mxu2 %v933_v38  ;;  %v989_v61 = vor.u32 %v1242_v59, %v988_v57  ;;  %v926_v62 = vld [vmem:[#allocation2 + $0x48] sm:$0xf0]  ;;  %v1241_v63 = vld [vmem:[#allocation2 + $0xc4] sm:$0xf]  ;;  %v916_v3 = vld [vmem:[#allocation2 + $0x30] sm:$0xf] }
  0x1b   :  { %377 = vmatpush.bf16.msra.mxu3 %v997_v44  ;;  %v990_v0 = vld [vmem:[#allocation2 + $0xc8] sm:$0xf0]  ;;  %v929_v1 = vor.u32 %v1225_v60, %v926_v62  ;;  %v1224_v4 = vld [vmem:[#allocation2 + $0x34] sm:$0xf0]  ;;  %v980_v6 = vld [vmem:[#allocation2 + $0xb0] sm:$0xf] }
  0x1c   :  { %v89_v32 = vadd.f32 %v1308_v2, %v88_v21  ;;  %390 = vmatpush.bf16.msrb.mxu0 %v937_v48  ;;  %v917_v7 = vor.u32 %v1224_v4, %v916_v3  ;;  %v1240_v8 = vld [vmem:[#allocation2 + $0xb4] sm:$0xf0]  ;;  %v1223_v9 = vld [vmem:[#allocation2 + $0x34] sm:$0xf]  ;;  %v918_v10 = vld [vmem:[#allocation2 + $0x38] sm:$0xf0] }
  0x1d   :  { %403 = vmatpush.bf16.msrb.mxu1 %v1001_v49  ;;  %v981_v11 = vor.u32 %v1240_v8, %v980_v6  ;;  %v921_v12 = vor.u32 %v1223_v9, %v918_v10  ;;  %v1239_v13 = vld [vmem:[#allocation2 + $0xb4] sm:$0xf]  ;;  %v982_v14 = vld [vmem:[#allocation2 + $0xb8] sm:$0xf0]  ;;  %v908_v16 = vld [vmem:[#allocation2 + $0x20] sm:$0xf] }
  0x1e   :  { %v91_v43 = vsel %vm90_vm0, %v1308_v2, %v89_v32  ;;  %365 = vmatpush.bf16.msra.mxu2 %v925_v58  ;;  %v993_v2 = vor.u32 %v1241_v63, %v990_v0  ;;  %v985_v15 = vor.u32 %v1239_v13, %v982_v14  ;;  %v1222_v17 = vld [vmem:[#allocation2 + $0x24] sm:$0xf0]  ;;  %v972_v18 = vld [vmem:[#allocation2 + $0xa0] sm:$0xf]  ;;  %v1221_v21 = vld [vmem:[#allocation2 + $0x24] sm:$0xf] }
  0x1f   :  { %v92_v47 = vmul.f32 %v91_v43, %v82_v27  ;;  %378 = vmatpush.bf16.msra.mxu3 %v989_v61  ;;  %v909_v19 = vor.u32 %v1222_v17, %v908_v16  ;;  %v1238_v20 = vld [vmem:[#allocation2 + $0xa4] sm:$0xf0]  ;;  %v910_v22 = vld [vmem:[#allocation2 + $0x28] sm:$0xf0]  ;;  %v1237_v25 = vld [vmem:[#allocation2 + $0xa4] sm:$0xf] }
  0x20   :  { %391 = vmatpush.bf16.msrb.mxu0 %v929_v1  ;;  %v973_v23 = vor.u32 %v1238_v20, %v972_v18  ;;  %v913_v24 = vor.u32 %v1221_v21, %v910_v22  ;;  %v974_v26 = vld [vmem:[#allocation2 + $0xa8] sm:$0xf0]  ;;  %v900_v27 = vld [vmem:[#allocation2 + $0x10] sm:$0xf]  ;;  %v1220_v29 = vld [vmem:[#allocation2 + $0x14] sm:$0xf0] }
  0x21   :  { %v93_v50 = vmul.f32 2.0, %v92_v47  ;;  %404 = vmatpush.bf16.msrb.mxu1 %v993_v2  ;;  %v977_v28 = vor.u32 %v1237_v25, %v974_v26  ;;  %v964_v30 = vld [vmem:[#allocation2 + $0x90] sm:$0xf]  ;;  %v1236_v31 = vld [vmem:[#allocation2 + $0x94] sm:$0xf0]  ;;  %v901_v32 = vor.u32 %v1220_v29, %v900_v27 }
  0x22   :  { %366 = vmatpush.bf16.msra.mxu2 %v917_v7  ;;  %v965_v33 = vor.u32 %v1236_v31, %v964_v30  ;;  %v1219_v34 = vld [vmem:[#allocation2 + $0x14] sm:$0xf]  ;;  %v902_v35 = vld [vmem:[#allocation2 + $0x18] sm:$0xf0]  ;;  %v892_v39 = vld [vmem:[#allocation2] sm:$0xf] }
  0x23   :  { %v885_v52 = vadd.f32 -1.0, %v93_v50  ;;  %379 = vmatpush.bf16.msra.mxu3 %v981_v11  ;;  %v1235_v36 = vld [vmem:[#allocation2 + $0x94] sm:$0xf]  ;;  %v905_v37 = vor.u32 %v1219_v34, %v902_v35  ;;  %v966_v38 = vld [vmem:[#allocation2 + $0x98] sm:$0xf0] }
  0x24   :  { %392 = vmatpush.bf16.msrb.mxu0 %v921_v12  ;;  %v1218_v40 = vld [vmem:[#allocation2 + $0x4] sm:$0xf0]  ;;  %v969_v41 = vor.u32 %v1235_v36, %v966_v38  ;;  %v956_v43 = vld [vmem:[#allocation2 + $0x80] sm:$0xf]  ;;  %v1217_v45 = vld [vmem:[#allocation2 + $0x4] sm:$0xf] }
  0x25   :  { %v96_v53 = vsel %vm95_vm1, %v885_v52, 0.0  ;;  %405 = vmatpush.bf16.msrb.mxu1 %v985_v15  ;;  %v1234_v44 = vld [vmem:[#allocation2 + $0x84] sm:$0xf0]  ;;  %v893_v46 = vor.u32 %v1218_v40, %v892_v39  ;;  %v894_v47 = vld [vmem:[#allocation2 + $0x8] sm:$0xf0] }
  0x26   :  { %v97_v54 = vadd.f32 %v96_v53, %v1481_v51  ;;  %367 = vmatpush.bf16.msra.mxu2 %v909_v19  ;;  %v1233_v48 = vld [vmem:[#allocation2 + $0x84] sm:$0xf]  ;;  %v958_v49 = vld [vmem:[#allocation2 + $0x88] sm:$0xf0]  ;;  %v957_v50 = vor.u32 %v1234_v44, %v956_v43  ;;  %v897_v52 = vor.u32 %v1217_v45, %v894_v47  ;;  %v1280_v55 = vld [vmem:[#allocation4 + $0xf4] sm:$0xf0] }
  0x27   :  { %380 = vmatpush.bf16.msra.mxu3 %v973_v23  ;;  %v961_v53 = vor.u32 %v1233_v48, %v958_v49  ;;  %v1279_v56 = vld [vmem:[#allocation4 + $0xf4] sm:$0xf]  ;;  %v1144_v58 = vld [vmem:[#allocation4 + $0xf8] sm:$0xf0]  ;;  %v1134_v59 = vld [vmem:[#allocation4 + $0xe0] sm:$0xf] }
  0x28   :  { %886 = vmatmul.msk.f32.vlgmr.msra.gmra.mxu0 %vm106_vm2, %v97_v54  ;;  %887 = vmatmul.msk.f32.vlgmr.msra.gmra.mxu1 %vm106_vm2, %v97_v54  ;;  %v1142_v54 = vld [vmem:[#allocation4 + $0xf0] sm:$0xf]  ;;  %v1278_v60 = vld [vmem:[#allocation4 + $0xe4] sm:$0xf0]  ;;  %v1147_v61 = vor.u32 %v1279_v56, %v1144_v58  ;;  %v1277_v62 = vld [vmem:[#allocation4 + $0xe4] sm:$0xf] }
  0x29   :  { %393 = vmatpush.bf16.msrb.mxu0 %v913_v24  ;;  %406 = vmatpush.bf16.msrb.mxu1 %v977_v28  ;;  %v1143_v57 = vor.u32 %v1280_v55, %v1142_v54  ;;  %v1136_v63 = vld [vmem:[#allocation4 + $0xe8] sm:$0xf0]  ;;  %v1078_v0 = vld [vmem:[#allocation4 + $0x70] sm:$0xf]  ;;  %v1135_v1 = vor.u32 %v1278_v60, %v1134_v59  ;;  %v1264_v2 = vld [vmem:[#allocation4 + $0x74] sm:$0xf0] }
  0x2a   :  { %368 = vmatpush.bf16.msra.mxu2 %v901_v32  ;;  %v1263_v3 = vld [vmem:[#allocation4 + $0x74] sm:$0xf]  ;;  %v1080_v4 = vld [vmem:[#allocation4 + $0x78] sm:$0xf0]  ;;  %v1139_v6 = vor.u32 %v1277_v62, %v1136_v63  ;;  %v1079_v7 = vor.u32 %v1264_v2, %v1078_v0  ;;  %v1126_v9 = vld [vmem:[#allocation4 + $0xd0] sm:$0xf] }
  0x2b   :  { %381 = vmatpush.bf16.msra.mxu3 %v965_v33  ;;  %v1083_v8 = vor.u32 %v1263_v3, %v1080_v4  ;;  %v1276_v10 = vld [vmem:[#allocation4 + $0xd4] sm:$0xf0]  ;;  %v1275_v11 = vld [vmem:[#allocation4 + $0xd4] sm:$0xf]  ;;  %v1128_v12 = vld [vmem:[#allocation4 + $0xd8] sm:$0xf0] }
  0x2c   :  { %v100_v13 = vld [vmem:[%s1507_s2] sm:$0x3]  ;;  %v1127_v14 = vor.u32 %v1276_v10, %v1126_v9  ;;  %v1131_v15 = vor.u32 %v1275_v11, %v1128_v12  ;;  %v1262_v35 = vld [vmem:[#allocation4 + $0x64] sm:$0xf0]  ;;  %v1261_v36 = vld [vmem:[#allocation4 + $0x64] sm:$0xf] }
  0x2d   :  { %394 = vmatpush.bf16.msrb.mxu0 %v905_v37  ;;  %407 = vmatpush.bf16.msrb.mxu1 %v969_v41  ;;  %v102_v16 = vperm.slane %v100_v13, 0  ;;  %v103_v17 = vperm.slane %v100_v13, 1  ;;  %v1070_v34 = vld [vmem:[#allocation4 + $0x60] sm:$0xf]  ;;  %v1072_v38 = vld [vmem:[#allocation4 + $0x68] sm:$0xf0] }
  0x2e   :  { %369 = vmatpush.bf16.msra.mxu2 %v893_v46  ;;  %v1071_v37 = vor.u32 %v1262_v35, %v1070_v34  ;;  %v1075_v39 = vor.u32 %v1261_v36, %v1072_v38  ;;  %v1118_v40 = vld [vmem:[#allocation4 + $0xc0] sm:$0xf]  ;;  %v1274_v41 = vld [vmem:[#allocation4 + $0xc4] sm:$0xf0]  ;;  %v1273_v43 = vld [vmem:[#allocation4 + $0xc4] sm:$0xf] }
  0x2f   :  { %382 = vmatpush.bf16.msra.mxu3 %v957_v50  ;;  %v1119_v44 = vor.u32 %v1274_v41, %v1118_v40  ;;  %v1120_v45 = vld [vmem:[#allocation4 + $0xc8] sm:$0xf0]  ;;  %v1062_v47 = vld [vmem:[#allocation4 + $0x50] sm:$0xf]  ;;  %v1260_v48 = vld [vmem:[#allocation4 + $0x54] sm:$0xf0] }
  0x30   :  { %v1123_v46 = vor.u32 %v1273_v43, %v1120_v45  ;;  %v1259_v49 = vld [vmem:[#allocation4 + $0x54] sm:$0xf]  ;;  %v1063_v50 = vor.u32 %v1260_v48, %v1062_v47  ;;  %v1110_v54 = vld [vmem:[#allocation4 + $0xb0] sm:$0xf]  ;;  %v1272_v55 = vld [vmem:[#allocation4 + $0xb4] sm:$0xf0] }
  0x31   :  { %395 = vmatpush.bf16.msrb.mxu0 %v897_v52  ;;  %408 = vmatpush.bf16.msrb.mxu1 %v961_v53  ;;  %v1064_v52 = vld [vmem:[#allocation4 + $0x58] sm:$0xf0]  ;;  %v1271_v56 = vld [vmem:[#allocation4 + $0xb4] sm:$0xf]  ;;  %v1054_v60 = vld [vmem:[#allocation4 + $0x40] sm:$0xf] }
  0x32   :  { %626 = vmatpush.bf16.msrb.mxu2 %v1079_v7  ;;  %v1067_v53 = vor.u32 %v1259_v49, %v1064_v52  ;;  %v1112_v58 = vld [vmem:[#allocation4 + $0xb8] sm:$0xf0]  ;;  %v1257_v63 = vld [vmem:[#allocation4 + $0x44] sm:$0xf]  ;;  %v1056_v0 = vld [vmem:[#allocation4 + $0x48] sm:$0xf0] }
  0x33   :  { %639 = vmatpush.bf16.msrb.mxu3 %v1143_v57  ;;  %v1111_v57 = vor.u32 %v1272_v55, %v1110_v54  ;;  %v1115_v59 = vor.u32 %v1271_v56, %v1112_v58  ;;  %v1102_v2 = vld [vmem:[#allocation4 + $0xa0] sm:$0xf]  ;;  %v1270_v3 = vld [vmem:[#allocation4 + $0xa4] sm:$0xf0]  ;;  %v1269_v4 = vld [vmem:[#allocation4 + $0xa4] sm:$0xf] }
  0x34   :  { %v1104_v7 = vld [vmem:[#allocation4 + $0xa8] sm:$0xf0]  ;;  %v1046_v9 = vld [vmem:[#allocation4 + $0x30] sm:$0xf]  ;;  %v1256_v10 = vld [vmem:[#allocation4 + $0x34] sm:$0xf0] }
  0x35   :  { %665 = vmatpush.bf16.msra.mxu1 %v1147_v61  ;;  %652 = vmatpush.bf16.msra.mxu0 %v1083_v8  ;;  %v1258_v61 = vld [vmem:[#allocation4 + $0x44] sm:$0xf0]  ;;  %v1107_v8 = vor.u32 %v1269_v4, %v1104_v7  ;;  %v1255_v11 = vld [vmem:[#allocation4 + $0x34] sm:$0xf]  ;;  %v1047_v12 = vor.u32 %v1256_v10, %v1046_v9  ;;  %v1048_v13 = vld [vmem:[#allocation4 + $0x38] sm:$0xf0] }
  0x36   :  { %627 = vmatpush.bf16.msrb.mxu2 %v1071_v37  ;;  %v1055_v62 = vor.u32 %v1258_v61, %v1054_v60  ;;  %v1252_v34 = vld [vmem:[#allocation4 + $0x14] sm:$0xf0]  ;;  %v1251_v35 = vld [vmem:[#allocation4 + $0x14] sm:$0xf]  ;;  %v1032_v37 = vld [vmem:[#allocation4 + $0x18] sm:$0xf0] }
  0x37   :  { %640 = vmatpush.bf16.msrb.mxu3 %v1135_v1  ;;  %v1059_v1 = vor.u32 %v1257_v63, %v1056_v0  ;;  %v1035_v38 = vor.u32 %v1251_v35, %v1032_v37  ;;  %v1250_v40 = vld [vmem:[#allocation4 + $0x4] sm:$0xf0]  ;;  %v1249_v41 = vld [vmem:[#allocation4 + $0x4] sm:$0xf]  ;;  %v1296_v47 = vld [vmem:[#allocation6 + $0x78] sm:$0xff] }
  0x39   :  { %666 = vmatpush.bf16.msra.mxu1 %v1139_v6  ;;  %653 = vmatpush.bf16.msra.mxu0 %v1075_v39  ;;  %v1103_v6 = vor.u32 %v1270_v3, %v1102_v2  ;;  %v1022_v39 = vld [vmem:[#allocation4] sm:$0xf] }
  0x3a   :  { %628 = vmatpush.bf16.msrb.mxu2 %v1063_v50  ;;  %v1023_v43 = vor.u32 %v1250_v40, %v1022_v39 }
  0x3b   :  { %641 = vmatpush.bf16.msrb.mxu3 %v1127_v14  ;;  %v1051_v14 = vor.u32 %v1255_v11, %v1048_v13  ;;  %v1288_v13 = vld [vmem:[#allocation6 + $0x38] sm:$0xff] }
  0x3d   :  { %667 = vmatpush.bf16.msra.mxu1 %v1131_v15  ;;  %654 = vmatpush.bf16.msra.mxu0 %v1067_v53  ;;  %v1094_v15 = vld [vmem:[#allocation4 + $0x90] sm:$0xf] }
  0x3e   :  { %629 = vmatpush.bf16.msrb.mxu2 %v1055_v62 }
  0x3f   :  { %642 = vmatpush.bf16.msrb.mxu3 %v1119_v44  ;;  %v1024_v44 = vld [vmem:[#allocation4 + $0x8] sm:$0xf0] }
  0x40   :  { %v1027_v45 = vor.u32 %v1249_v41, %v1024_v44 }
  0x41   :  { %668 = vmatpush.bf16.msra.mxu1 %v1123_v46  ;;  %655 = vmatpush.bf16.msra.mxu0 %v1059_v1  ;;  %v196_v46 = vld [vmem:[%s1509_s4] sm:$0x3] }
  0x42   :  { %630 = vmatpush.bf16.msrb.mxu2 %v1047_v12  ;;  %v199_v48 = vperm.slane %v196_v46, 1  ;;  %v198_v54 = vperm.slane %v196_v46, 0  ;;  %v1295_v12 = vld [vmem:[#allocation6 + $0x70] sm:$0xff] }
  0x43   :  { %643 = vmatpush.bf16.msrb.mxu3 %v1111_v57 }
  0x45   :  { %669 = vmatpush.bf16.msra.mxu1 %v1115_v59  ;;  %656 = vmatpush.bf16.msra.mxu0 %v1051_v14  ;;  %v1294_v14 = vld [vmem:[#allocation6 + $0x68] sm:$0xff] }
  0x47   :  { %644 = vmatpush.bf16.msrb.mxu3 %v1103_v6 }
  0x49   :  { %670 = vmatpush.bf16.msra.mxu1 %v1107_v8 }
  0xa5   :  { %v127_v18 = vpop.f32.mrf.mxu0  ;;  %v147_v19 = vpop.f32.mrf.mxu1 }
  0xa6   :  { %v128_v20 = vadd.f32 %v127_v18, %v102_v16  ;;  %v148_v21 = vadd.f32 %v147_v19, %v103_v17  ;;  %v1268_v16 = vld [vmem:[#allocation4 + $0x94] sm:$0xf0]  ;;  %v1267_v17 = vld [vmem:[#allocation4 + $0x94] sm:$0xf]  ;;  %v1096_v19 = vld [vmem:[#allocation4 + $0x98] sm:$0xf0] }
  0xa7   :  { %v1095_v18 = vor.u32 %v1268_v16, %v1094_v15  ;;  %v1287_v15 = vld [vmem:[#allocation6 + $0x30] sm:$0xff]  ;;  %v1293_v16 = vld [vmem:[#allocation6 + $0x60] sm:$0xff] }
  0xa8   :  { %v152_v22 = vmin.f32 %v128_v20, 0.0  ;;  %v153_v23 = vmin.f32 %v148_v21, 0.0  ;;  %vm150_vm3 = vcmp.gt.f32.partialorder %v128_v20, 0.0  ;;  %vm151_vm4 = vcmp.gt.f32.partialorder %v148_v21, 0.0 }
  0xa9   :  { %645 = vmatpush.bf16.msrb.mxu3 %v1095_v18  ;;  %v1292_v18 = vld [vmem:[#allocation6 + $0x58] sm:$0xff] }
  0xaa   :  { %v154_v24 = vmul.f32 1.442695, %v152_v22  ;;  %v156_v25 = vmul.f32 1.442695, %v153_v23  ;;  %v1254_v22 = vld [vmem:[#allocation4 + $0x24] sm:$0xf0] }
  0xab   :  { %v1253_v23 = vld [vmem:[#allocation4 + $0x24] sm:$0xf] }
  0xac   :  { %1309 = vpow2.f32 %v154_v24 }
  0xad   :  { %1311 = vpow2.f32 %v156_v25  ;;  %v1040_v25 = vld [vmem:[#allocation4 + $0x28] sm:$0xf0] }
  0xb2   :  { %v1310_v26 = vpop.eup %1309 }
  0xb3   :  { %v1312_v27 = vpop.eup %1311  ;;  %v888_v28 = vadd.f32 -1.0, %v1310_v26  ;;  %v1043_v26 = vor.u32 %v1253_v23, %v1040_v25  ;;  %v1283_v23 = vld [vmem:[#allocation6 + $0x10] sm:$0xff]  ;;  %v1282_v25 = vld [vmem:[#allocation6 + $0x8] sm:$0xff] }
  0xb4   :  { %v889_v29 = vadd.f32 -1.0, %v1312_v27  ;;  %v1086_v27 = vld [vmem:[#allocation4 + $0x80] sm:$0xf] }
  0xb5   :  { %v160_v30 = vsel %vm150_vm3, %v128_v20, %v888_v28  ;;  %v1099_v20 = vor.u32 %v1267_v17, %v1096_v19  ;;  %v1266_v28 = vld [vmem:[#allocation4 + $0x84] sm:$0xf0]  ;;  %657 = vmatpush.bf16.msra.mxu0 %v1043_v26  ;;  %v1285_v19 = vld [vmem:[#allocation6 + $0x20] sm:$0xff] }
  0xb6   :  { %v162_v31 = vpack.c.bf16 %v160_v30, %v160_v30  ;;  %v161_v32 = vsel %vm151_vm4, %v148_v21, %v889_v29  ;;  %v1038_v21 = vld [vmem:[#allocation4 + $0x20] sm:$0xf]  ;;  %v1265_v29 = vld [vmem:[#allocation4 + $0x84] sm:$0xf]  ;;  %v1087_v30 = vor.u32 %v1266_v28, %v1086_v27  ;;  %v1286_v17 = vld [vmem:[#allocation6 + $0x28] sm:$0xff] }
  0xb7   :  { %v163_v33 = vpack.c.bf16 %v161_v32, %v161_v32  ;;  %v1039_v24 = vor.u32 %v1254_v22, %v1038_v21  ;;  %671 = vmatpush.bf16.msra.mxu1 %v1099_v20  ;;  %v1291_v20 = vld [vmem:[#allocation6 + $0x50] sm:$0xff]  ;;  %v1284_v21 = vld [vmem:[#allocation6 + $0x18] sm:$0xff]  ;;  %v1290_v22 = vld [vmem:[#allocation6 + $0x48] sm:$0xff] }
  0xb8   :  { %370 = vmatmul.bf16.vlgmr.msra.gmra.mxu2 %v162_v31  ;;  %396 = vmatmul.bf16.vlgmr.msrb.gmra.mxu0 %v162_v31  ;;  %v1088_v31 = vld [vmem:[#allocation4 + $0x88] sm:$0xf0]  ;;  %v1281_v26 = vld [vmem:[#allocation6] sm:$0xff] }
  0xb9   :  { %383 = vmatmul.bf16.vlgmr.msra.gmra.mxu3 %v163_v33  ;;  %409 = vmatmul.bf16.vlgmr.msrb.gmra.mxu1 %v163_v33  ;;  %v1091_v32 = vor.u32 %v1265_v29, %v1088_v31  ;;  %v1030_v33 = vld [vmem:[#allocation4 + $0x10] sm:$0xf]  ;;  %v460_v28 = vld [vmem:[%s1511_s6] sm:$0x3]  ;;  %v1405_v29 = vmov 1.0  }
  0xba   :  { %631 = vmatpush.bf16.msrb.mxu2 %v1039_v24  ;;  %646 = vmatpush.bf16.msrb.mxu3 %v1087_v30  ;;  %v1031_v36 = vor.u32 %v1252_v34, %v1030_v33  ;;  %v1289_v24 = vld [vmem:[#allocation6 + $0x40] sm:$0xff]  ;;  %v463_v30 = vperm.slane %v460_v28, 1 }
  0xbb   :  { %672 = vmatpush.bf16.msra.mxu1 %v1091_v32  ;;  %658 = vmatpush.bf16.msra.mxu0 %v1035_v38 }
  0xbe   :  { %632 = vmatpush.bf16.msrb.mxu2 %v1031_v36  ;;  %837 = vmatpush.bf16.msra.mxu3 %v1296_v47  ;;  %v462_v36 = vperm.slane %v460_v28, 0 }
  0xbf   :  { %659 = vmatpush.bf16.msra.mxu0 %v1027_v45 }
  0xc2   :  { %633 = vmatpush.bf16.msrb.mxu2 %v1023_v43  ;;  %838 = vmatpush.bf16.msra.mxu3 %v1295_v12 }
  0xc3   :  { %1215 = vmatpush.msk.msrb.mxu0 %vm850_vm7, %v1405_v29 }
  0xc6   :  { %824 = vmatpush.bf16.msra.mxu2 %v1288_v13  ;;  %839 = vmatpush.bf16.msra.mxu3 %v1294_v14 }
  0xca   :  { %825 = vmatpush.bf16.msra.mxu2 %v1287_v15  ;;  %840 = vmatpush.bf16.msra.mxu3 %v1293_v16 }
  0xce   :  { %826 = vmatpush.bf16.msra.mxu2 %v1286_v17  ;;  %841 = vmatpush.bf16.msra.mxu3 %v1292_v18 }
  0xd2   :  { %827 = vmatpush.bf16.msra.mxu2 %v1285_v19  ;;  %842 = vmatpush.bf16.msra.mxu3 %v1291_v20 }
  0xd6   :  { %828 = vmatpush.bf16.msra.mxu2 %v1284_v21  ;;  %843 = vmatpush.bf16.msra.mxu3 %v1290_v22 }
  0xda   :  { %829 = vmatpush.bf16.msra.mxu2 %v1283_v23  ;;  %844 = vmatpush.bf16.msra.mxu3 %v1289_v24 }
  0xde   :  { %830 = vmatpush.bf16.msra.mxu2 %v1282_v25 }
  0xe2   :  { %831 = vmatpush.bf16.msra.mxu2 %v1281_v26 }
 0x135   :  { %v397_v49 = vpop.f32.mrf.mxu0 }
 0x136   :  { %v398_v50 = vadd.f32 %v397_v49, %v199_v48  ;;  %v410_v52 = vpop.f32.mrf.mxu1 }
 0x138   :  { %v411_v53 = vadd.f32 %v410_v52, %v398_v50 }
 0x13a   :  { %v417_v55 = vmin.f32 %v411_v53, 0.0  ;;  %vm415_vm5 = vcmp.gt.f32.partialorder %v411_v53, 0.0 }
 0x13b   :  { %v371_v56 = vpop.f32.mrf.mxu2 }
 0x13c   :  { %v420_v57 = vmul.f32 1.442695, %v417_v55  ;;  %v372_v58 = vadd.f32 %v371_v56, %v198_v54  ;;  %v384_v59 = vpop.f32.mrf.mxu3  ;;  %v1306_v55 = vld [vmem:[%s1513_s8] ss:$0 sm:$0xff] }
 0x13d   :  { %v399_v60 = vpop.f32.mrf.mxu0 }
 0x13e   :  { %1313 = vpow2.f32 %v420_v57  ;;  %v385_v61 = vadd.f32 %v384_v59, %v372_v58  ;;  %v412_v62 = vpop.f32.mrf.mxu1 }
 0x140   :  { %v416_v63 = vmin.f32 %v385_v61, 0.0  ;;  %vm414_vm6 = vcmp.gt.f32.partialorder %v385_v61, 0.0 }
 0x142   :  { %v418_v0 = vmul.f32 1.442695, %v416_v63 }
 0x143   :  { %v373_v1 = vpop.f32.mrf.mxu2 }
 0x144   :  { %v1314_v2 = vpop.eup %1313  ;;  %1315 = vpow2.f32 %v418_v0  ;;  %v386_v3 = vpop.f32.mrf.mxu3 }
 0x145   :  { %v1019_v4 = vadd.f32 -1.0, %v1314_v2 }
 0x147   :  { %v425_v6 = vsel %vm415_vm5, %v411_v53, %v1019_v4 }
 0x148   :  { %v427_v7 = vpack.c.bf16 %v425_v6, %v425_v6 }
 0x14a   :  { %v1316_v8 = vpop.eup %1315  ;;  %647 = vmatmul.bf16.vlgmr.msrb.gmra.mxu3 %v427_v7  ;;  %673 = vmatmul.bf16.vlgmr.msra.gmra.mxu1 %v427_v7 }
 0x14b   :  { %v1018_v9 = vadd.f32 -1.0, %v1316_v8 }
 0x14d   :  { %v424_v10 = vsel %vm414_vm6, %v385_v61, %v1018_v9 }
 0x14e   :  { %v426_v11 = vpack.c.bf16 %v424_v10, %v424_v10 }
 0x150   :  { %634 = vmatmul.bf16.vlgmr.msrb.gmra.mxu2 %v426_v11  ;;  %660 = vmatmul.bf16.vlgmr.msra.gmra.mxu0 %v426_v11 }
 0x160   :  { %1216 = vmatmul.msk.f32.vlgmr.msrb.gmra.mxu0 %vm106_vm2, %v1481_v51 }
 0x1c7   :  { %v674_v27 = vpop.f32.mrf.mxu1 }
 0x1cd   :  { %v648_v31 = vpop.f32.mrf.mxu3  ;;  %v661_v32 = vpop.f32.mrf.mxu0 }
 0x1ce   :  { %v662_v33 = vadd.f32 %v661_v32, %v463_v30 }
 0x1cf   :  { %v676_v34 = vpop.f32.mrf.mxu1 }
 0x1d0   :  { %v675_v35 = vadd.f32 %v674_v27, %v662_v33 }
 0x1d2   :  { %v681_v37 = vmin.f32 %v675_v35, 0.0  ;;  %vm679_vm8 = vcmp.gt.f32.partialorder %v675_v35, 0.0 }
 0x1d3   :  { %v635_v5 = vpop.f32.mrf.mxu2 }
 0x1d4   :  { %v684_v42 = vmul.f32 1.442695, %v681_v37  ;;  %v636_v38 = vadd.f32 %v635_v5, %v462_v36 }
 0x1d5   :  { %v650_v39 = vpop.f32.mrf.mxu3  ;;  %v663_v40 = vpop.f32.mrf.mxu0 }
 0x1d6   :  { %1317 = vpow2.f32 %v684_v42  ;;  %v649_v41 = vadd.f32 %v648_v31, %v636_v38 }
 0x1d8   :  { %v680_v43 = vmin.f32 %v649_v41, 0.0  ;;  %vm678_vm9 = vcmp.gt.f32.partialorder %v649_v41, 0.0 }
 0x1da   :  { %v682_v44 = vmul.f32 1.442695, %v680_v43 }
 0x1db   :  { %v637_v45 = vpop.f32.mrf.mxu2 }
 0x1dc   :  { %v1318_v46 = vpop.eup %1317  ;;  %1319 = vpow2.f32 %v682_v44 }
 0x1dd   :  { %v1149_v51 = vadd.f32 -1.0, %v1318_v46  ;;  %v873_v60 = vpop.f32.mrf.mxu0 }
 0x1df   :  { %v689_v47 = vsel %vm679_vm8, %v675_v35, %v1149_v51 }
 0x1e0   :  { %v691_v48 = vpack.c.bf16 %v689_v47, %v689_v47 }
 0x1e2   :  { %v1320_v49 = vpop.eup %1319  ;;  %845 = vmatmul.bf16.vlgmr.msra.gmra.mxu3 %v691_v48 }
 0x1e3   :  { %v1148_v50 = vadd.f32 -1.0, %v1320_v49 }
 0x1e5   :  { %v688_v52 = vsel %vm678_vm9, %v649_v41, %v1148_v50 }
 0x1e6   :  { %v690_v53 = vpack.c.bf16 %v688_v52, %v688_v52 }
 0x1e8   :  { %832 = vmatmul.bf16.vlgmr.msra.gmra.mxu2 %v690_v53 }
 0x265   :  { %v846_v54 = vpop.f32.mrf.mxu3 }
 0x26b   :  { %v833_v56 = vpop.f32.mrf.mxu2 }
 0x26c   :  { %v834_v57 = vadd.f32 %v1306_v55, %v833_v56 }
 0x26d   :  { %v848_v58 = vpop.f32.mrf.mxu3 }
 0x26e   :  { %v847_v59 = vadd.f32 %v846_v54, %v834_v57 }
 0x270   :  { %v876_v61 = vmul.f32 1e-06, %v847_v59 }
 0x272   :  { %v877_v62 = vadd.f32 %v876_v61, %v873_v60 }
 0x273   :  { %v835_v63 = vpop.f32.mrf.mxu2 }
 0x274   :  { %878 = vst [vmem:[%s1514_s9] sm:$0xff] %v877_v62 }
 0x275   :  { %883 = vsyncpa [#allocation3], 1 }
 0x276   :  { %884 = vsyncpa [#allocation5], 1 }

</bundles_post_ra>
